<compile_context>
chip_gen: v7x
topology: tpu7x:2x2x1
jax: 0.10.0
libtpu: 0.0.40
codegen_flags: <defaults>
</compile_context>

<pallas_src>
import functools

import jax
import jax.numpy as jnp
from jax import lax
from jax.experimental import pallas as pl
from jax.experimental.pallas import tpu as pltpu


def _conv3x3_bias_relu_kernel(x_ref, w_ref, b_ref, o_ref, xpad_ref, col_ref, *,
                              H, W, Cin, Cout, negative_slope):
    """One batch image: 3x3 'same' conv + bias + ReLU, lane-dense output.

    x_ref   : (1, Cin, H*W)          flat NCHW input block
    w_ref   : (Cout, 9*Cin)          weight, tap-major columns (dh, dw, ci)
    b_ref   : (Cout, 1)              bias (broadcast shape)
    o_ref   : (1, Cout, H*W)         lane-dense output block
    xpad_ref: (Cin, H*W + 2*W + 2)   VMEM scratch: row-padded flat image
    col_ref : (9*Cin, H*W)           VMEM scratch: im2col slab
    """
    HW = H * W
    PAD = W + 1  # front padding so the most-negative tap offset (-W-1) stays in-bounds

    # ---- in-kernel zero padding (flat slab; interior written once) ----
    xpad_ref[...] = jnp.zeros_like(xpad_ref)
    xpad_ref[:, PAD:PAD + HW] = x_ref[0]

    # Column index j of every output pixel (hoisted out of the tap loop).
    jj = lax.broadcasted_iota(jnp.int32, (Cin, HW), 1) % W

    # ---- build the (9*Cin, H*W) im2col slab: 9 static lane windows + edge masks ----
    # window[ci, p] = xpad[ci, p + dh*W + dw] == x[ci, i+dh-1, j+dw-1] for valid sources;
    # top/bottom out-of-bounds rows land in the zero pad, left/right need a column mask.
    for dh in range(3):
        for dw in range(3):
            tap = dh * 3 + dw
            start = dh * W + dw
            window = xpad_ref[:, start:start + HW]            # (Cin, HW)
            if dw == 0:
                window = jnp.where(jj >= 1, window, 0.0)       # source col j-1 >= 0
            elif dw == 2:
                window = jnp.where(jj <= W - 2, window, 0.0)   # source col j+1 <  W
            col_ref[tap * Cin:(tap + 1) * Cin, :] = window

    # ---- single MXU matmul: (Cout, 9*Cin) @ (9*Cin, H*W) ----
    acc = jnp.dot(w_ref[...], col_ref[...],
                  preferred_element_type=jnp.float32)          # (Cout, HW)
    acc = acc + b_ref[...]                                     # bias broadcast (Cout, 1)
    if negative_slope == 0.0:
        acc = jnp.maximum(acc, 0.0)                            # ReLU (default ConvBlock)
    else:
        acc = jnp.where(acc >= 0.0, acc, negative_slope * acc)  # LeakyReLU(alpha)
    o_ref[0] = acc.astype(o_ref.dtype)


def conv_block(x_nchw, w, b, *, is_leaky=False, alpha=0.1):
    """Forward of ConvBlock(in_ch, out_ch, is_bn=False): Conv2d(3x3, pad=1) + (Leaky)ReLU.

    x_nchw: (N, Cin, H, W) float32
    w     : (Cout, Cin, 3, 3)   PyTorch Conv2d weight layout
    b     : (Cout,)
    returns (N, Cout, H, W)
    """
    # TODO(synk): is_bn=True (BatchNorm2d) branch of ConvBlock is not implemented; the
    # default is_bn=False path (Conv2d + ReLU / LeakyReLU) is covered.
    N, Cin, H, W = x_nchw.shape
    Cout = w.shape[0]
    HW = H * W

    # Pre-reshape params once (stay VMEM-resident via constant index_map).
    # w_mat[co, (dh*3+dw)*Cin + ci] = w[co, ci, dh, dw]
    w_mat = jnp.transpose(w, (0, 2, 3, 1)).reshape(Cout, 9 * Cin)
    b_col = b.reshape(Cout, 1)
    x_flat = x_nchw.reshape(N, Cin, HW)           # contiguous -> free reshape, no transpose

    kernel = functools.partial(
        _conv3x3_bias_relu_kernel,
        H=H, W=W, Cin=Cin, Cout=Cout,
        negative_slope=(alpha if is_leaky else 0.0),
    )

    out = pl.pallas_call(
        kernel,
        out_shape=jax.ShapeDtypeStruct((N, Cout, HW), x_nchw.dtype),
        grid=(N,),
        in_specs=[
            pl.BlockSpec((1, Cin, HW), lambda n: (n, 0, 0)),
            pl.BlockSpec((Cout, 9 * Cin), lambda n: (0, 0)),
            pl.BlockSpec((Cout, 1), lambda n: (0, 0)),
        ],
        out_specs=pl.BlockSpec((1, Cout, HW), lambda n: (n, 0, 0)),
        scratch_shapes=[
            pltpu.VMEM((Cin, HW + 2 * W + 2), jnp.float32),   # row-padded flat image
            pltpu.VMEM((9 * Cin, HW), jnp.float32),           # im2col slab
        ],
        compiler_params=pltpu.CompilerParams(
            dimension_semantics=("parallel",)),               # N=2 -> both v7x TCs busy
    )(x_flat, w_mat, b_col)

    return out.reshape(N, Cout, H, W)


if __name__ == "__main__":
    in_ch, out_ch = 4, 8
    N, H, W = 2, 16, 16

    key = jax.random.PRNGKey(0)
    k1, k2, k3 = jax.random.split(key, 3)

    x = jax.random.normal(k1, (N, in_ch, H, W), jnp.float32)
    # Deterministic synthetic parameters (PyTorch-style uniform bounds).
    bound = 1.0 / (in_ch * 9) ** 0.5
    w = jax.random.uniform(k2, (out_ch, in_ch, 3, 3), jnp.float32, -bound, bound)
    b = jax.random.uniform(k3, (out_ch,), jnp.float32, -bound, bound)

    y = jax.block_until_ready(conv_block(x, w, b))
    assert y.shape == (N, out_ch, H, W), y.shape

    # Reference: XLA conv (PyTorch Conv2d is cross-correlation; NCHW/OIHW matches directly).
    ref = lax.conv_general_dilated(
        x, w, window_strides=(1, 1), padding=((1, 1), (1, 1)),
        dimension_numbers=("NCHW", "OIHW", "NCHW"))
    ref = jnp.maximum(ref + b[None, :, None, None], 0.0)
    assert jnp.allclose(y, ref, atol=1e-5, rtol=1e-5), float(jnp.max(jnp.abs(y - ref)))

    print("KERNEL_OK")
</pallas_src>

<mosaic_0001>
module attributes {stable_mosaic.version = 11 : i64} {
  func.func @_conv3x3_bias_relu_kernel(%arg0: i32, %arg1: memref<1x4x256xf32, #tpu.memory_space<vmem>>, %arg2: memref<8x36xf32, #tpu.memory_space<vmem>>, %arg3: memref<8x1xf32, #tpu.memory_space<vmem>>, %arg4: memref<1x8x256xf32, #tpu.memory_space<vmem>>, %arg5: memref<4x290xf32, #tpu.memory_space<vmem>>, %arg6: memref<36x256xf32, #tpu.memory_space<vmem>>) attributes {dimension_semantics = [#tpu.dimension_semantics<parallel>], iteration_bounds = array<i64: 2>, scalar_prefetch = 0 : i64, scratch_operands = 2 : i64, tpu.core_type = #tpu.core_type<tc>, window_params = [{transform_indices = @transform_0, window_bounds = array<i64: 1, 4, 256>}, {pipeline_mode = #tpu.pipeline_mode<synchronous>, transform_indices = @transform_1, window_bounds = array<i64: 8, 36>}, {pipeline_mode = #tpu.pipeline_mode<synchronous>, transform_indices = @transform_2, window_bounds = array<i64: 8, 1>}, {transform_indices = @transform_3, window_bounds = array<i64: 1, 8, 256>}]} {
    %cst = arith.constant 0.000000e+00 : f32
    %0 = vector.broadcast %cst : f32 to vector<4x290xf32>
    %c0 = arith.constant 0 : index
    %c0_0 = arith.constant 0 : index
    %1 = vector.load %arg5[%c0, %c0_0] : memref<4x290xf32, #tpu.memory_space<vmem>>, vector<4x290xf32>
    tpu.vector_store %arg5[%c0, %c0_0], %0 {strides = array<i32>} : memref<4x290xf32, #tpu.memory_space<vmem>>, vector<4x290xf32>,
    %c0_1 = arith.constant 0 : index
    %c0_2 = arith.constant 0 : index
    %c0_3 = arith.constant 0 : index
    %2 = vector.load %arg1[%c0_1, %c0_2, %c0_3] : memref<1x4x256xf32, #tpu.memory_space<vmem>>, vector<1x4x256xf32>
    %3 = vector.shape_cast %2 : vector<1x4x256xf32> to vector<4x256xf32>
    %c0_4 = arith.constant 0 : index
    %c17 = arith.constant 17 : index
    %4 = vector.load %arg5[%c0_4, %c17] : memref<4x290xf32, #tpu.memory_space<vmem>>, vector<4x256xf32>
    tpu.vector_store %arg5[%c0_4, %c17], %3 {strides = array<i32>} : memref<4x290xf32, #tpu.memory_space<vmem>>, vector<4x256xf32>,
    %5 = tpu.iota {dimensions = array<i32: 1>} : vector<4x256xi32>
    %c16_i32 = arith.constant 16 : i32
    %c0_i32 = arith.constant 0 : i32
    %6 = arith.cmpi eq, %c16_i32, %c0_i32 : i32
    %c1_i32 = arith.constant 1 : i32
    %7 = arith.select %6, %c1_i32, %c16_i32 : i32
    %8 = vector.broadcast %7 : i32 to vector<4x256xi32>
    %9 = arith.remsi %5, %8 : vector<4x256xi32>
    %c0_i32_5 = arith.constant 0 : i32
    %10 = vector.broadcast %c0_i32_5 : i32 to vector<4x256xi32>
    %11 = arith.cmpi ne, %9, %10 : vector<4x256xi32>
    %c0_i32_6 = arith.constant 0 : i32
    %12 = vector.broadcast %c0_i32_6 : i32 to vector<4x256xi32>
    %13 = arith.cmpi slt, %9, %12 : vector<4x256xi32>
    %c0_i32_7 = arith.constant 0 : i32
    %14 = arith.cmpi slt, %7, %c0_i32_7 : i32
    %15 = vector.broadcast %14 : i1 to vector<4x256xi1>
    %16 = vector.broadcast %15 : vector<4x256xi1> to vector<4x256xi1>
    %17 = arith.xori %13, %16 : vector<4x256xi1>
    %18 = arith.andi %17, %11 : vector<4x256xi1>
    %19 = vector.broadcast %7 : i32 to vector<4x256xi32>
    %20 = arith.addi %9, %19 : vector<4x256xi32>
    %21 = arith.select %18, %20, %9 : vector<4x256xi1>, vector<4x256xi32>
    %c0_8 = arith.constant 0 : index
    %c0_9 = arith.constant 0 : index
    %22 = vector.load %arg5[%c0_8, %c0_9] : memref<4x290xf32, #tpu.memory_space<vmem>>, vector<4x256xf32>
    %c1_i32_10 = arith.constant 1 : i32
    %23 = vector.broadcast %c1_i32_10 : i32 to vector<4x256xi32>
    %24 = arith.cmpi sge, %21, %23 : vector<4x256xi32>
    %cst_11 = arith.constant 0.000000e+00 : f32
    %25 = vector.broadcast %cst_11 : f32 to vector<4x256xf32>
    %26 = arith.select %24, %22, %25 : vector<4x256xi1>, vector<4x256xf32>
    %c0_12 = arith.constant 0 : index
    %c0_13 = arith.constant 0 : index
    %27 = vector.load %arg6[%c0_12, %c0_13] : memref<36x256xf32, #tpu.memory_space<vmem>>, vector<4x256xf32>
    tpu.vector_store %arg6[%c0_12, %c0_13], %26 {strides = array<i32>} : memref<36x256xf32, #tpu.memory_space<vmem>>, vector<4x256xf32>,
    %c0_14 = arith.constant 0 : index
    %c1 = arith.constant 1 : index
    %28 = vector.load %arg5[%c0_14, %c1] : memref<4x290xf32, #tpu.memory_space<vmem>>, vector<4x256xf32>
    %c4 = arith.constant 4 : index
    %c0_15 = arith.constant 0 : index
    %29 = vector.load %arg6[%c4, %c0_15] : memref<36x256xf32, #tpu.memory_space<vmem>>, vector<4x256xf32>
    tpu.vector_store %arg6[%c4, %c0_15], %28 {strides = array<i32>} : memref<36x256xf32, #tpu.memory_space<vmem>>, vector<4x256xf32>,
    %c0_16 = arith.constant 0 : index
    %c2 = arith.constant 2 : index
    %30 = vector.load %arg5[%c0_16, %c2] : memref<4x290xf32, #tpu.memory_space<vmem>>, vector<4x256xf32>
    %c14_i32 = arith.constant 14 : i32
    %31 = vector.broadcast %c14_i32 : i32 to vector<4x256xi32>
    %32 = arith.cmpi sle, %21, %31 : vector<4x256xi32>
    %cst_17 = arith.constant 0.000000e+00 : f32
    %33 = vector.broadcast %cst_17 : f32 to vector<4x256xf32>
    %34 = arith.select %32, %30, %33 : vector<4x256xi1>, vector<4x256xf32>
    %c8 = arith.constant 8 : index
    %c0_18 = arith.constant 0 : index
    %35 = vector.load %arg6[%c8, %c0_18] : memref<36x256xf32, #tpu.memory_space<vmem>>, vector<4x256xf32>
    tpu.vector_store %arg6[%c8, %c0_18], %34 {strides = array<i32>} : memref<36x256xf32, #tpu.memory_space<vmem>>, vector<4x256xf32>,
    %c0_19 = arith.constant 0 : index
    %c16 = arith.constant 16 : index
    %36 = vector.load %arg5[%c0_19, %c16] : memref<4x290xf32, #tpu.memory_space<vmem>>, vector<4x256xf32>
    %c1_i32_20 = arith.constant 1 : i32
    %37 = vector.broadcast %c1_i32_20 : i32 to vector<4x256xi32>
    %38 = arith.cmpi sge, %21, %37 : vector<4x256xi32>
    %cst_21 = arith.constant 0.000000e+00 : f32
    %39 = vector.broadcast %cst_21 : f32 to vector<4x256xf32>
    %40 = arith.select %38, %36, %39 : vector<4x256xi1>, vector<4x256xf32>
    %c12 = arith.constant 12 : index
    %c0_22 = arith.constant 0 : index
    %41 = vector.load %arg6[%c12, %c0_22] : memref<36x256xf32, #tpu.memory_space<vmem>>, vector<4x256xf32>
    tpu.vector_store %arg6[%c12, %c0_22], %40 {strides = array<i32>} : memref<36x256xf32, #tpu.memory_space<vmem>>, vector<4x256xf32>,
    %c0_23 = arith.constant 0 : index
    %c17_24 = arith.constant 17 : index
    %42 = vector.load %arg5[%c0_23, %c17_24] : memref<4x290xf32, #tpu.memory_space<vmem>>, vector<4x256xf32>
    %c16_25 = arith.constant 16 : index
    %c0_26 = arith.constant 0 : index
    %43 = vector.load %arg6[%c16_25, %c0_26] : memref<36x256xf32, #tpu.memory_space<vmem>>, vector<4x256xf32>
    tpu.vector_store %arg6[%c16_25, %c0_26], %42 {strides = array<i32>} : memref<36x256xf32, #tpu.memory_space<vmem>>, vector<4x256xf32>,
    %c0_27 = arith.constant 0 : index
    %c18 = arith.constant 18 : index
    %44 = vector.load %arg5[%c0_27, %c18] : memref<4x290xf32, #tpu.memory_space<vmem>>, vector<4x256xf32>
    %c14_i32_28 = arith.constant 14 : i32
    %45 = vector.broadcast %c14_i32_28 : i32 to vector<4x256xi32>
    %46 = arith.cmpi sle, %21, %45 : vector<4x256xi32>
    %cst_29 = arith.constant 0.000000e+00 : f32
    %47 = vector.broadcast %cst_29 : f32 to vector<4x256xf32>
    %48 = arith.select %46, %44, %47 : vector<4x256xi1>, vector<4x256xf32>
    %c20 = arith.constant 20 : index
    %c0_30 = arith.constant 0 : index
    %49 = vector.load %arg6[%c20, %c0_30] : memref<36x256xf32, #tpu.memory_space<vmem>>, vector<4x256xf32>
    tpu.vector_store %arg6[%c20, %c0_30], %48 {strides = array<i32>} : memref<36x256xf32, #tpu.memory_space<vmem>>, vector<4x256xf32>,
    %c0_31 = arith.constant 0 : index
    %c32 = arith.constant 32 : index
    %50 = vector.load %arg5[%c0_31, %c32] : memref<4x290xf32, #tpu.memory_space<vmem>>, vector<4x256xf32>
    %c1_i32_32 = arith.constant 1 : i32
    %51 = vector.broadcast %c1_i32_32 : i32 to vector<4x256xi32>
    %52 = arith.cmpi sge, %21, %51 : vector<4x256xi32>
    %cst_33 = arith.constant 0.000000e+00 : f32
    %53 = vector.broadcast %cst_33 : f32 to vector<4x256xf32>
    %54 = arith.select %52, %50, %53 : vector<4x256xi1>, vector<4x256xf32>
    %c24 = arith.constant 24 : index
    %c0_34 = arith.constant 0 : index
    %55 = vector.load %arg6[%c24, %c0_34] : memref<36x256xf32, #tpu.memory_space<vmem>>, vector<4x256xf32>
    tpu.vector_store %arg6[%c24, %c0_34], %54 {strides = array<i32>} : memref<36x256xf32, #tpu.memory_space<vmem>>, vector<4x256xf32>,
    %c0_35 = arith.constant 0 : index
    %c33 = arith.constant 33 : index
    %56 = vector.load %arg5[%c0_35, %c33] : memref<4x290xf32, #tpu.memory_space<vmem>>, vector<4x256xf32>
    %c28 = arith.constant 28 : index
    %c0_36 = arith.constant 0 : index
    %57 = vector.load %arg6[%c28, %c0_36] : memref<36x256xf32, #tpu.memory_space<vmem>>, vector<4x256xf32>
    tpu.vector_store %arg6[%c28, %c0_36], %56 {strides = array<i32>} : memref<36x256xf32, #tpu.memory_space<vmem>>, vector<4x256xf32>,
    %c0_37 = arith.constant 0 : index
    %c34 = arith.constant 34 : index
    %58 = vector.load %arg5[%c0_37, %c34] : memref<4x290xf32, #tpu.memory_space<vmem>>, vector<4x256xf32>
    %c14_i32_38 = arith.constant 14 : i32
    %59 = vector.broadcast %c14_i32_38 : i32 to vector<4x256xi32>
    %60 = arith.cmpi sle, %21, %59 : vector<4x256xi32>
    %cst_39 = arith.constant 0.000000e+00 : f32
    %61 = vector.broadcast %cst_39 : f32 to vector<4x256xf32>
    %62 = arith.select %60, %58, %61 : vector<4x256xi1>, vector<4x256xf32>
    %c32_40 = arith.constant 32 : index
    %c0_41 = arith.constant 0 : index
    %63 = vector.load %arg6[%c32_40, %c0_41] : memref<36x256xf32, #tpu.memory_space<vmem>>, vector<4x256xf32>
    tpu.vector_store %arg6[%c32_40, %c0_41], %62 {strides = array<i32>} : memref<36x256xf32, #tpu.memory_space<vmem>>, vector<4x256xf32>,
    %c0_42 = arith.constant 0 : index
    %c0_43 = arith.constant 0 : index
    %64 = vector.load %arg2[%c0_42, %c0_43] : memref<8x36xf32, #tpu.memory_space<vmem>>, vector<8x36xf32>
    %c0_44 = arith.constant 0 : index
    %c0_45 = arith.constant 0 : index
    %65 = vector.load %arg6[%c0_44, %c0_45] : memref<36x256xf32, #tpu.memory_space<vmem>>, vector<36x256xf32>
    %cst_46 = arith.constant dense<0.000000e+00> : vector<8x256xf32>
    %66 = tpu.matmul %64, %65, %cst_46 {dimension_numbers = #tpu.dot_dimension_numbers<[1], [0], [0], [1], [0, 0, 1, 1], [], []>} : vector<8x36xf32>, vector<36x256xf32>, vector<8x256xf32> -> vector<8x256xf32>
    %c0_47 = arith.constant 0 : index
    %c0_48 = arith.constant 0 : index
    %67 = vector.load %arg3[%c0_47, %c0_48] : memref<8x1xf32, #tpu.memory_space<vmem>>, vector<8x1xf32>
    %68 = vector.broadcast %67 : vector<8x1xf32> to vector<8x256xf32>
    %69 = arith.addf %66, %68 : vector<8x256xf32>
    %cst_49 = arith.constant 0.000000e+00 : f32
    %70 = vector.broadcast %cst_49 : f32 to vector<8x256xf32>
    %71 = arith.maximumf %69, %70 : vector<8x256xf32>
    %c0_50 = arith.constant 0 : index
    %c0_51 = arith.constant 0 : index
    %c0_52 = arith.constant 0 : index
    %72 = vector.load %arg4[%c0_50, %c0_51, %c0_52] : memref<1x8x256xf32, #tpu.memory_space<vmem>>, vector<1x8x256xf32>
    %73 = vector.shape_cast %72 : vector<1x8x256xf32> to vector<8x256xf32>
    %74 = vector.shape_cast %71 : vector<8x256xf32> to vector<1x8x256xf32>
    tpu.vector_store %arg4[%c0_50, %c0_51, %c0_52], %74 {strides = array<i32>} : memref<1x8x256xf32, #tpu.memory_space<vmem>>, vector<1x8x256xf32>,
    return
  }
  func.func @transform_0(%arg0: i32) -> (i32, i32, i32) {
    %c0_i32 = arith.constant 0 : i32
    %c0_i32_0 = arith.constant 0 : i32
    %c0_i32_1 = arith.constant 0 : i32
    return %arg0, %c0_i32, %c0_i32_0 : i32, i32, i32
  }
  func.func @transform_1(%arg0: i32) -> (i32, i32) {
    %c0_i32 = arith.constant 0 : i32
    %c0_i32_0 = arith.constant 0 : i32
    %c0_i32_1 = arith.constant 0 : i32
    return %c0_i32, %c0_i32_0 : i32, i32
  }
  func.func @transform_2(%arg0: i32) -> (i32, i32) {
    %c0_i32 = arith.constant 0 : i32
    %c0_i32_0 = arith.constant 0 : i32
    %c0_i32_1 = arith.constant 0 : i32
    return %c0_i32, %c0_i32_0 : i32, i32
  }
  func.func @transform_3(%arg0: i32) -> (i32, i32, i32) {
    %c0_i32 = arith.constant 0 : i32
    %c0_i32_0 = arith.constant 0 : i32
    %c0_i32_1 = arith.constant 0 : i32
    return %arg0, %c0_i32, %c0_i32_0 : i32, i32, i32
  }
}

</mosaic_0001>

<bundles_post_ra>
// kernel: tpu_custom_call.1
= control target key start
LH: loop header
LB: loop body
LE: loop exit
PB: predicated region body
PF: predicated region fallthrough
CT: control target
= control target key end

     0   :  { %8 = vsyncpa [#allocation5], 0  ;;  %s1063_s0 = inlined_call_operand.hbm [shape: f32[2,4,256], index: 0, kind: input, shape index: {}]   ;;  %s1064_s1 = inlined_call_operand.vmem [shape: f32[8,36], index: 1, kind: input, shape index: {}]   ;;  %s1065_s2 = inlined_call_operand.vmem [shape: f32[8,1], index: 2, kind: input, shape index: {}]   ;;  %s1066_s3 = inlined_call_operand.hbm [shape: f32[2,8,256], index: 3, kind: output, shape index: {}]  }
   0x1   :  { %10 = vsyncpa [#allocation5 + $0x1], 0 }
   0x2   :  { %11 = vsyncpa [#allocation6], 0 }
   0x3   :  { %13 = vsyncpa [#allocation6 + $0x1], 0  ;;  %s821_s12 = smov 0   ;;  %s823_s13 = smov 0  }
   0x4   :  { %s825_s14 = smov 0   ;;  %s827_s15 = smov 0  }
   0x5 LB: > { %s842_s16 = sadd.s32 4294967295, %s786_s15   ;;  %s600_s17 = sadd.s32 4294967294, %s786_s15   ;;  %s786_s15 = sphi %s827_s15, %s1089_s15   ;;  %s782_s14 = sphi %s825_s14, %s1088_s14   ;;  %s778_s13 = sphi %s823_s13, %s1087_s13   ;;  %s774_s12 = sphi %s821_s12, %s1086_s12  }
   0x6   : > { %s846_s18 = sadd.s32 1, %s786_s15   ;;  %s26_s19 = sadd.s32 1, %s782_s14 }
   0x7   : > { %s23_s20 = ssub.s32 %s786_s15, %s846_s18  ;;  %p33_p0 = scmp.ne.s32.totalorder %s782_s14, %s778_s13 }
   0x8   : > { %p24_p1 = scmp.eq.s32.totalorder %s23_s20, 0  ;;  %p34_p2 = scmp.eq.s32.totalorder %s786_s15, 0 }
   0x9   : > { %p39_p3 = scmp.ne.s32.totalorder %s778_s13, %s774_s12  ;;  %p40_p4 = scmp.eq.s32.totalorder %s842_s16, 0 }
   0xa   : > { %s858_s21 = scalar_select %p24_p1, %s782_s14, %s26_s19  }
   0xb   : > { %p860_p5 = por %p34_p2, %p33_p0  ;;  %p864_p6 = por %p40_p4, %p39_p3 }
   0xc   : > { %p105_p7 = scmp.eq.s32.totalorder %s842_s16, 1  ;;  %p111_p8 = scmp.eq.s32.totalorder %s600_s17, 1 }
   0xd   : > { %p639_p10 = scmp.lt.s32.totalorder %s786_s15, 2  ;;  %s137_s26 = sand.u32 1, %s782_s14  }
   0xe   : > { %p871_p11 = por %p105_p7, %p33_p0  ;;  %p875_p12 = por %p111_p8, %p39_p3 }
   0xf   : > { %s617_s27 = sshll.u32 %s786_s15, 7  ;;  %s603_s28 = sshll.u32 %s137_s26, 3 }
  0x10   : > { %s1070_s24 = scalar_select %p871_p11, 1, 0 }
  0x11   : > { %s1071_s25 = scalar_select %p875_p12, 1, 0 }
  0x12   : > { %s884_s4 = scalar_lea.hbm %s1063_s0, %s617_s27  ;;  %s141_s5 = scalar_lea.vmem [#allocation4], %s603_s28 }
  0x13   : > { %s149_s6 = sshll.u32 %s141_s5, 4  ;;  %p888_p13 = pnand %p639_p10, %p860_p5  ;;  %s892_s6 = int_to_ptr.vmem [resolvable:$true] %s149_s6 }
  0x14   : > { %s138_s8 = scalar_lea.sflag [#allocation5], %s137_s26  ;;  %s690_s9 = scalar_lea.hbm %s884_s4, 128 }
  0x15   : > { %p691_p2 = scmp.ne.s32.totalorder %s884_s4, %s690_s9  ;;  %p692_p3 = pneg %p888_p13 }
  0x16   : > { %s695_s17 = scalar_lea.hbm %s1063_s0, 256  ;;  %p696_p5 = scmp.lt.u32.totalorder %s884_s4, %s1063_s0 }
  0x17   : > { %p693_p4 = pnand %p692_p3, %p691_p2  ;;  %p697_p8 = scmp.lt.u32.totalorder %s695_s17, %s690_s9 }
  0x18   : > { %p699_p9 = scmp.lt.u32.totalorder %s690_s9, %s884_s4 }
  0x19   : > { %p694_p7 = pneg %p693_p4  ;;  %p698_p10 = por %p697_p8, %p696_p5 }
  0x1b   : > { %p700_p0 = por %p699_p9, %p698_p10 }
  0x1d   : > { %p701_p1 = pnand %p700_p0, %p694_p7 }
  0x1f   : > { %704 = shalt.err (!%p701_p1)
}
  0x20   : > { %s705_s22 = scalar_lea.vmem %s892_s6, 128  ;;  %s788_s26 = smov [#allocation4]  }
  0x21   : > { %p706_p2 = scmp.ne.s32.totalorder %s892_s6, %s705_s22  ;;  %s710_s27 = sshll.u32 %s788_s26, 4  ;;  %s711_s27 = int_to_ptr.vmem [resolvable:$false] %s710_s27 }
  0x22   : > { %s712_s28 = scalar_lea.vmem %s711_s27, 256  ;;  %p713_p11 = scmp.lt.s32.totalorder %s892_s6, %s711_s27 }
  0x23   : > { %p708_p4 = pnand %p706_p2, %p692_p3  ;;  %p714_p5 = scmp.lt.s32.totalorder %s712_s28, %s705_s22 }
  0x25   : > { %p709_p12 = pneg %p708_p4  ;;  %p715_p8 = por %p714_p5, %p713_p11 }
  0x27   : > { %p716_p9 = pnand %p715_p8, %p709_p12 }
  0x29   : > { %719 = shalt.err (!%p716_p9)
}
  0x2a   : > { %634 = dma.hbm_to_vmem [thread:$0]  (!%p888_p13), %s884_s4, 128, %s892_s6, %s138_s8  }
  0x2b   : > { %p1073_p0 = scmp.lt.s32.totalorder %s786_s15, 3  ;;  %p1074_p1 = scmp.ge.s32.totalorder %s786_s15, 1 }
  0x2d   : > { %p155_p3 = pnand %p1074_p1, %p1073_p0 }
  0x2e   : > { %s926_s29 = sand.u32 (!%p155_p3), 1, %s778_s13  }
  0x2f   : > { %158 = sbr.rel (%p155_p3) target bundleno = 584 (0x248), region = 32  ;;  %s607_s30 = sshll.u32 (!%p155_p3), %s926_s29, 3 }
  0x30   : > { %s161_s5 = scalar_lea.sflag (!%p155_p3), [#allocation5], %s926_s29  ;;  %s164_s9 = scalar_lea.vmem (!%p155_p3), [#allocation4], %s607_s30 }
  0x36   : > { %765 = dma.done.wait (%p864_p6), %s161_s5, 128  }
  0x37   : > { %767 = vsyncadd (%p864_p6), %s161_s5, 4294967168  ;;  %vm188_vm0 = vcmask 273408   ;;  %v789_v0 = vmov 0.0   ;;  %v190_v1 = vld [vmem:[%s164_s9] sm:$0xff]  ;;  %s790_s4 = smov 17   ;;  %v205_v2 = vlaneseq  ;;  %vm199_vm1 = vcmask 1043592  }
  0x38   : > { %187 = vst [vmem:[#allocation2] sm:$0xff] %v789_v0  ;;  %189 = vst.msk [vmem:[#allocation2 + $0x8] sm:$0xf] %vm188_vm0, %v789_v0  ;;  %504 = vmatprep.mubr.f32.mxu0 %v789_v0  ;;  %192 = vrot.lane.b32.xlu0 %v190_v1, %s790_s4  ;;  %vm200_vm2 = vcmask 1047556   ;;  %vm195_vm3 = vcmask 138240   ;;  %vm203_vm4 = vcmask 134144  }
  0x39   : > { %v934_v3 = vand.u32 127, %v205_v2  ;;  %vm201_vm5 = vmor %vm200_vm2, %vm199_vm1  ;;  %s791_s23 = smov 96   ;;  %s792_s6 = smov 112   ;;  %v799_v25 = vmov 0   ;;  %v423_v26 = vld [vmem:[%s1065_s2] sm:$0xff]  ;;  %vm254_vm8 = vcmask 1039360  }
  0x3a   : > { %s793_s7 = smov 111   ;;  %s794_s8 = smov 126   ;;  %684 = vset.pattern.permute.xlu1 %v799_v25  ;;  %685 = vset.pattern.permute.xlu0 %v799_v25  ;;  %vm385_vm9 = vcmask 777216   ;;  %vm294_vm10 = vcmask 916480   ;;  %vm274_vm11 = vcmask 1031168   ;;  %vm338_vm14 = vcmask 900096  }
  0x3b   : > { %v937_v7 = vadd.s32 128, %v934_v3  ;;  %v212_v8 = vand.u32 15, %v934_v3  ;;  %s795_s10 = smov 110   ;;  %s796_s11 = smov 127   ;;  %vm364_vm15 = vcmask 785408   ;;  %vm320_vm0 = vcmask 908288  }
  0x3c   : > { %s797_s17 = smov 95   ;;  %s798_s19 = smov 94   ;;  %vm403_vm1 = vcmask 769024   ;;  %vm433_vm2 = vcmask 1043456  }
  0x3d   : > { %v219_v9 = vand.u32 15, %v937_v7  ;;  %vm943_vm6 = vcmp.ge.s32.totalorder %v212_v8, 1  ;;  %vm979_vm12 = vcmp.le.s32.totalorder %v212_v8, 14  ;;  %s608_s28 = sshll.u32 %s926_s29, 4  ;;  %s618_s30 = sshll.u32 %s842_s16, 8 }
  0x3e   : > { %s186_s5 = scalar_lea.vmem [#allocation7], %s608_s28  ;;  %p1083_p11 = scmp.ne.s32.totalorder %s1070_s24, 0 }
  0x3f   : > { %vm951_vm7 = vcmp.ge.s32.totalorder %v219_v9, 1  ;;  %vm985_vm13 = vcmp.le.s32.totalorder %v219_v9, 14  ;;  %s530_s9 = sshll.u32 %s186_s5, 4  ;;  %s800_s16 = smov [#allocation7]   ;;  %s1021_s9 = int_to_ptr.vmem [resolvable:$true] %s530_s9 }
  0xaa   : > { %v193_v4 = vpop.permute.xlu0 %192 }
  0xab   : > { %v194_v5 = vrot.slane %v193_v4, 4 }
  0xad   : > { %v196_v6 = vsel %vm195_vm3, %v194_v5, %v193_v4  ;;  %204 = vst.msk [vmem:[#allocation2 + $0x8] sm:$0xf] %vm203_vm4, %v194_v5  ;;  %vm429_vm3 = vcmask 293888  }
  0xae   : > { %202 = vst.msk [vmem:[#allocation2] sm:$0xff] %vm201_vm5, %v196_v6 }
  0xb4   : > { %v354_v10 = vld [vmem:[#allocation2 + $0x8] sm:$0xf] }
  0xb5   : > { %v284_v11 = vld [vmem:[#allocation2 + $0x8] sm:$0xf]  ;;  %362 = vrot.lane.b32.xlu0 %v354_v10, %s791_s23  ;;  %v242_v13 = vld [vmem:[#allocation2] sm:$0xff] }
  0xb6   : > { %292 = vrot.lane.b32.xlu1 %v284_v11, %s792_s6  ;;  %v287_v15 = vcombine.high %v242_v13, %v242_v13  ;;  %v238_v16 = vsel %vm943_vm6, %v242_v13, 0.0  ;;  %v310_v17 = vld [vmem:[#allocation2 + $0x8] sm:$0xf]  ;;  %v246_v23 = vcombine.low %v242_v13, %v242_v13 }
  0xb7   : > { %v262_v18 = vld [vmem:[#allocation2 + $0x8] sm:$0xf]  ;;  %240 = vst [vmem:[#allocation3] sm:$0xf] %v238_v16 }
  0xb8   : > { %v239_v19 = vsel %vm951_vm7, %v287_v15, 0.0  ;;  %v328_v20 = vld [vmem:[#allocation2 + $0x8] sm:$0xf] }
  0xb9   : > { %318 = vrot.lane.b32.xlu0 %v310_v17, %s793_s7  ;;  %241 = vst [vmem:[#allocation3 + $0x8] sm:$0xf] %v239_v19  ;;  %v688_v21 = vld [vmem:[#allocation2 + $0x8] ss:$0 sps:$4 sm:$0xff]  }
  0xba   : > { %272 = vrot.lane.b32.xlu1 %v262_v18, %s794_s8  ;;  %v689_v22 = vld [vmem:[#allocation2 + $0x8] ss:$0 sps:$4 sm:$0xff]  }
  0xbb   : > { %v393_v24 = vld [vmem:[#allocation2 + $0x8] sm:$0xf] }
  0xbd   : > { %250 = vrot.lane.b32.xlu0 %v242_v13, %s796_s11 }
  0xbe   : > { %336 = vrot.lane.b32.xlu1 %v328_v20, %s795_s10 }
  0xc1   : > { %268 = vrot.lane.b32.xlu0 %v242_v13, %s794_s8 }
  0xc2   : > { %288 = vrot.lane.b32.xlu1 %v242_v13, %s792_s6 }
  0xc5   : > { %332 = vrot.lane.b32.xlu0 %v242_v13, %s795_s10 }
  0xc6   : > { %358 = vrot.lane.b32.xlu1 %v242_v13, %s791_s23 }
  0xc9   : > { %381 = vrot.lane.b32.xlu0 %v242_v13, %s797_s17 }
  0xca   : > { %252 = vrot.lane.b32.xlu1 %v688_v21, %s796_s11 }
  0xcd   : > { %290 = vrot.lane.b32.xlu0 %v287_v15, %s792_s6  ;;  %s1019_s6 = scalar_lea.hbm %s1066_s3, %s618_s30 }
  0xce   : > { %383 = vrot.lane.b32.xlu1 %v689_v22, %s797_s17 }
  0xd1   : > { %270 = vrot.lane.b32.xlu0 %v287_v15, %s794_s8  ;;  %s720_s8 = scalar_lea.vmem %s1021_s9, 256 }
  0xd2   : > { %248 = vrot.lane.b32.xlu1 %v246_v23, %s796_s11  ;;  %p721_p6 = scmp.ne.s32.totalorder %s1021_s9, %s720_s8 }
  0xd4   : > { %p722_p12 = pnand %p721_p6, %p1083_p11 }
  0xd5   : > { %334 = vrot.lane.b32.xlu0 %v287_v15, %s795_s10  ;;  %s724_s10 = sshll.u32 %s800_s16, 4  ;;  %s725_s10 = int_to_ptr.vmem [resolvable:$false] %s724_s10 }
  0xd6   : > { %360 = vrot.lane.b32.xlu1 %v287_v15, %s791_s23  ;;  %p723_p13 = pneg %p722_p12  ;;  %s726_s11 = scalar_lea.vmem %s725_s10, 512 }
  0xd7   : > { %p727_p7 = scmp.lt.s32.totalorder %s1021_s9, %s725_s10  ;;  %p728_p10 = scmp.lt.s32.totalorder %s726_s11, %s720_s8 }
  0xd9   : > { %314 = vrot.lane.b32.xlu0 %v242_v13, %s793_s7  ;;  %p729_p2 = por %p728_p10, %p727_p7 }
  0xda   : > { %316 = vrot.lane.b32.xlu1 %v287_v15, %s793_s7  ;;  %s516_s7 = scalar_lea.sflag [#allocation6], %s926_s29 }
  0xdb   : > { %p730_p4 = pnand %p729_p2, %p723_p13 }
  0xdd   : > { %399 = vrot.lane.b32.xlu0 %v287_v15, %s798_s19 }
  0xde   : > { %379 = vrot.lane.b32.xlu1 %v246_v23, %s797_s17 }
  0xe1   : > { %397 = vrot.lane.b32.xlu0 %v242_v13, %s798_s19 }
  0xe2   : > { %401 = vrot.lane.b32.xlu1 %v393_v24, %s798_s19 }
  0xe6   : > { %426 = vperm.xlu1 %684, %v423_v26  }
 0x127   : > { %v363_v27 = vpop.permute.xlu0 %362 }
 0x128   : > { %v293_v28 = vpop.permute.xlu1 %292 }
 0x12b   : > { %v966_v29 = vpop.permute.xlu0 %318 }
 0x12c   : > { %v273_v30 = vpop.permute.xlu1 %272 }
 0x12f   : > { %v251_v32 = vpop.permute.xlu0 %250 }
 0x130   : > { %v337_v31 = vpop.permute.xlu1 %336 }
 0x133   : > { %v269_v34 = vpop.permute.xlu0 %268 }
 0x134   : > { %v289_v33 = vpop.permute.xlu1 %288 }
 0x137   : > { %v333_v36 = vpop.permute.xlu0 %332 }
 0x138   : > { %v359_v35 = vpop.permute.xlu1 %358 }
 0x13b   : > { %v968_v38 = vpop.permute.xlu0 %381 }
 0x13c   : > { %v253_v37 = vpop.permute.xlu1 %252 }
 0x13d   : > { %v256_v39 = vsel %vm254_vm8, %v251_v32, %v253_v37 }
 0x13e   : > { %260 = vst [vmem:[#allocation3 + $0x8] sm:$0xf0] %v256_v39 }
 0x13f   : > { %v291_v41 = vpop.permute.xlu0 %290 }
 0x140   : > { %v384_v40 = vpop.permute.xlu1 %383  ;;  %v295_v43 = vsel %vm294_vm10, %v289_v33, %v291_v41  ;;  %v296_v44 = vsel %vm294_vm10, %v291_v41, %v293_v28  ;;  %v412_v33 = vld [vmem:[%s1064_s1] sm:$0xff] }
 0x141   : > { %v387_v42 = vsel %vm385_vm9, %v968_v38, %v384_v40  ;;  %v299_v45 = vsel %vm943_vm6, %v295_v43, 0.0  ;;  %v300_v46 = vsel %vm951_vm7, %v296_v44, 0.0 }
 0x142   : > { %391 = vst [vmem:[#allocation3 + $0x38] sm:$0xf0] %v387_v42  ;;  %v303_v47 = vrot.slane %v299_v45, 4  ;;  %v304_v48 = vrot.slane %v300_v46, 4 }
 0x143   : > { %v271_v51 = vpop.permute.xlu0 %270 }
 0x144   : > { %v249_v52 = vpop.permute.xlu1 %248  ;;  %307 = vst [vmem:[#allocation3 + $0x10] sm:$0xf0] %v303_v47  ;;  %308 = vst [vmem:[#allocation3 + $0x18] sm:$0xf0] %v304_v48  ;;  %v275_v53 = vsel %vm274_vm11, %v269_v34, %v271_v51  ;;  %v276_v54 = vsel %vm274_vm11, %v271_v51, %v273_v30 }
 0x145   : > { %v255_v55 = vsel %vm254_vm8, %v249_v52, %v251_v32  ;;  %v279_v56 = vsel %vm979_vm12, %v275_v53, 0.0  ;;  %v280_v57 = vsel %vm985_vm13, %v276_v54, 0.0  ;;  %v414_v11 = vld [vmem:[#allocation3 + $0x8] sm:$0xff] }
 0x146   : > { %259 = vst [vmem:[#allocation3] sm:$0xf0] %v255_v55  ;;  %281 = vst [vmem:[#allocation3 + $0x10] sm:$0xf] %v279_v56 }
 0x147   : > { %282 = vst [vmem:[#allocation3 + $0x18] sm:$0xf] %v280_v57  ;;  %v335_v58 = vpop.permute.xlu0 %334 }
 0x148   : > { %v361_v59 = vpop.permute.xlu1 %360  ;;  %v339_v60 = vsel %vm338_vm14, %v333_v36, %v335_v58  ;;  %v340_v61 = vsel %vm338_vm14, %v335_v58, %v337_v31 }
 0x149   : > { %v365_v62 = vsel %vm364_vm15, %v359_v35, %v361_v59  ;;  %v366_v63 = vsel %vm364_vm15, %v361_v59, %v363_v27  ;;  %v343_v0 = vsel %vm979_vm12, %v339_v60, 0.0  ;;  %v344_v1 = vsel %vm985_vm13, %v340_v61, 0.0 }
 0x14a   : > { %v369_v2 = vsel %vm943_vm6, %v365_v62, 0.0  ;;  %v370_v3 = vsel %vm951_vm7, %v366_v63, 0.0  ;;  %v347_v4 = vrot.slane %v343_v0, 4  ;;  %v348_v5 = vrot.slane %v344_v1, 4 }
 0x14b   : > { %371 = vst [vmem:[#allocation3 + $0x30] sm:$0xf] %v369_v2  ;;  %372 = vst [vmem:[#allocation3 + $0x38] sm:$0xf] %v370_v3  ;;  %v315_v6 = vpop.permute.xlu0 %314 }
 0x14c   : > { %v317_v7 = vpop.permute.xlu1 %316  ;;  %351 = vst [vmem:[#allocation3 + $0x20] sm:$0xf0] %v347_v4  ;;  %352 = vst [vmem:[#allocation3 + $0x28] sm:$0xf0] %v348_v5 }
 0x14d   : > { %v321_v8 = vsel %vm320_vm0, %v315_v6, %v317_v7  ;;  %v322_v9 = vsel %vm320_vm0, %v317_v7, %v966_v29  ;;  %v413_v10 = vld [vmem:[#allocation3] sm:$0xff]  ;;  %v415_v13 = vld [vmem:[#allocation3 + $0x10] sm:$0xff] }
 0x14e   : > { %325 = vst [vmem:[#allocation3 + $0x20] sm:$0xf] %v321_v8  ;;  %326 = vst [vmem:[#allocation3 + $0x28] sm:$0xf] %v322_v9  ;;  %v416_v12 = vld [vmem:[#allocation3 + $0x18] sm:$0xff]  ;;  %v621_v15 = vpack.c.bf16 %v415_v13, %v413_v10 }
 0x14f   : > { %v619_v14 = vpack.c.bf16 %v416_v12, %v414_v11  ;;  %v400_v16 = vpop.permute.xlu0 %399 }
 0x150   : > { %v380_v17 = vpop.permute.xlu1 %379 }
 0x151   : > { %v386_v18 = vsel %vm385_vm9, %v380_v17, %v968_v38  ;;  %620 = vmatprep.subr.bf16.mxu0 %v619_v14 }
 0x152   : > { %390 = vst [vmem:[#allocation3 + $0x30] sm:$0xf0] %v386_v18  ;;  %622 = vmatpush1.bf16.msra.mxu0 %v621_v15  ;;  %v420_v24 = vld [vmem:[#allocation3 + $0x38] sm:$0xff] }
 0x153   : > { %v398_v19 = vpop.permute.xlu0 %397 }
 0x154   : > { %v402_v20 = vpop.permute.xlu1 %401  ;;  %v404_v21 = vsel %vm403_vm1, %v398_v19, %v400_v16 }
 0x155   : > { %v405_v22 = vsel %vm403_vm1, %v400_v16, %v402_v20  ;;  %v418_v23 = vld [vmem:[#allocation3 + $0x28] sm:$0xff]  ;;  %v408_v25 = vsel %vm979_vm12, %v404_v21, 0.0  ;;  %v417_v28 = vld [vmem:[#allocation3 + $0x20] sm:$0xff] }
 0x156   : > { %v409_v26 = vsel %vm985_vm13, %v405_v22, 0.0  ;;  %v623_v27 = vpack.c.bf16 %v420_v24, %v418_v23  ;;  %410 = vst [vmem:[#allocation3 + $0x40] sm:$0xf] %v408_v25 }
 0x157   : > { %411 = vst [vmem:[#allocation3 + $0x48] sm:$0xf] %v409_v26 }
 0x158   : > { %624 = vmatprep.subr.bf16.mxu0 %v623_v27 }
 0x159   : > { %v419_v29 = vld [vmem:[#allocation3 + $0x30] sm:$0xff] }
 0x15a   : > { %v625_v30 = vpack.c.bf16 %v419_v29, %v417_v28 }
 0x15c   : > { %626 = vmatpush1.bf16.msra.mxu0 %v625_v30 }
 0x15d   : > { %v421_v32 = vld [vmem:[#allocation3 + $0x40] sm:$0xf] }
 0x15e   : > { %v422_v31 = vld [vmem:[#allocation3 + $0x48] sm:$0xf] }
 0x15f   : > { %609 = vmatprep.subr.msk.mxu0 %vm433_vm2, %v422_v31 }
 0x160   : > { %610 = vmatpush1.msk.msra.mxu0 %vm433_vm2, %v421_v32 }
 0x161   : > { %611 = vmatmul.mubr.msk.f32.vlgmr.msra.gmra.mrb[0].mxu0 %vm429_vm3, %v412_v33 }
 0x165   : > { %v427_v34 = vpop.permute.xlu1 %426 }
 0x234   : > { %v506_v35 = vpop.f32.mrb[0].mxu0 }
 0x235   : > { %v507_v36 = vadd.f32 %v506_v35, %v427_v34  ;;  %v508_v37 = vpop.f32.mrb[1].mxu0 }
 0x236   : > { %v509_v38 = vadd.f32 %v508_v37, %v427_v34 }
 0x237   : > { %v511_v39 = vmax.f32 %v507_v36, 0.0 }
 0x238   : > { %v512_v40 = vmax.f32 %v509_v38, 0.0 }
 0x239   : > { %513 = vst [vmem:[%s186_s5] sm:$0xff] %v511_v39 }
 0x23a   : > { %514 = vst [vmem:[%s186_s5 + $0x8] sm:$0xff] %v512_v40 }
 0x23b   : > { %733 = shalt.err (!%p730_p4)
}
 0x23c   : > { %s734_s29 = scalar_lea.hbm %s1019_s6, 256  ;;  %s738_s20 = scalar_lea.hbm %s1066_s3, 512 }
 0x23d   : > { %p735_p5 = scmp.ne.s32.totalorder %s1019_s6, %s734_s29  ;;  %p739_p0 = scmp.lt.u32.totalorder %s1019_s6, %s1066_s3 }
 0x23e   : > { %p740_p1 = scmp.lt.u32.totalorder %s738_s20, %s734_s29  ;;  %p742_p6 = scmp.lt.u32.totalorder %s734_s29, %s1019_s6 }
 0x23f   : > { %p736_p8 = pnand %p735_p5, %p1083_p11 }
 0x240   : > { %p741_p3 = por %p740_p1, %p739_p0 }
 0x241   : > { %p737_p9 = pneg %p736_p8 }
 0x242   : > { %p743_p12 = por %p742_p6, %p741_p3 }
 0x244   : > { %p744_p13 = pnand %p743_p12, %p737_p9 }
 0x246   : > { %747 = shalt.err (!%p744_p13)
}
 0x247   : > { %629 = dma.vmem_to_hbm [thread:$0]  (%p1083_p11), %s1021_s9, 256, %s1019_s6, %s516_s7  }
 0x248 PF: > { %s542_s27 = sand.u32 1, %s774_s12   ;;  %p1084_p7 = scmp.ne.s32.totalorder %s1071_s25, 0 }
 0x249   : > { %p1085_p10 = scmp.ge.s32.totalorder %s786_s15, 2  ;;  %s543_s28 = scalar_lea.sflag [#allocation6], %s542_s27 }
 0x24b   : > { %p636_p2 = pnand %p1085_p10, %p1084_p7 }
 0x24d   : > { %769 = dma.done.wait (!%p636_p2), %s543_s28, 256  }
 0x24e   : > { %771 = vsyncadd (!%p636_p2), %s543_s28, 4294967040  ;;  %p16_p4 = scmp.ge.s32.totalorder %s846_s18, 4   ;;  %s1086_s12 = smov %s778_s13 }
 0x24f   : > { %s1087_s13 = smov %s782_s14  ;;  %s1088_s14 = smov %s858_s21 }
 0x250   : > { %s1089_s15 = smov %s846_s18  ;;  %18 = sbr.rel (!%p16_p4) target bundleno = 5 (0x5), region = 77 }
 0x257   :  { %548 = vsyncpa [#allocation5], 1 }
 0x258   :  { %550 = vsyncpa [#allocation5 + $0x1], 1 }
 0x259   :  { %551 = vsyncpa [#allocation6], 1 }
 0x25a   :  { %553 = vsyncpa [#allocation6 + $0x1], 1 }

</bundles_post_ra>
